<compile_context>
chip_gen: v7x
topology: tpu7x:2x2x1
jax: 0.10.0
libtpu: 0.0.40
codegen_flags: <defaults>
</compile_context>

<pallas_src>
import functools

import jax
import jax.numpy as jnp
import numpy as np
from jax.experimental import pallas as pl
from jax.experimental.pallas import tpu as pltpu

_LANE = 128  # lane width of a vreg


def _tuple_mlp_kernel(x_ref, w1_ref, b1_ref, w2_ref, b2_ref, out_ref):
    # x_ref:   [TN, (K+1)*F]  stacked (neighbors..., target) features per tuple,
    #                         in the gather's natural layout (no HBM transpose).
    # w1_ref:  [(K+1)*F, H]   effective first-layer weight (1/K mean folded in).
    # b1_ref:  [1, H]
    # w2_ref:  [H, 1]
    # b2_ref:  [1, 1]
    # out_ref: [TN, 1]
    x = x_ref[...].astype(w1_ref.dtype)  # no-op when the stream dtype already matches

    # Layer 1: one (K+1)*F-deep MXU contraction == mean + concat + Linear.
    h = jnp.dot(x, w1_ref[...], preferred_element_type=jnp.float32)      # [TN, H]
    h = jnp.maximum(h + b1_ref[...].astype(jnp.float32), 0.0)            # bias + ReLU (f32 VPU)

    # Layer 2: H-deep contraction down to one logit per tuple.
    logits = jnp.dot(h.astype(w2_ref.dtype), w2_ref[...],
                     preferred_element_type=jnp.float32)                 # [TN, 1]
    logits = logits + b2_ref[...].astype(jnp.float32)

    # Sigmoid (EUP) + store.
    out_ref[...] = jax.nn.sigmoid(logits).astype(out_ref.dtype)


def _floor_pow2(x):
    return 1 << (max(int(x), 1).bit_length() - 1)


@functools.partial(jax.jit, static_argnames=("tile_budget_bytes", "bucket"))
def tuple_average_predictor_fwd(gnn_h, tuples, triplets, params, *,
                                tile_budget_bytes=2 << 20, bucket=True):
    """Pallas implementation of TupleAveragePredictor.forward (num_layers=2)."""
    w1, b1, w2, b2 = params["w1"], params["b1"], params["w2"], params["b2"]
    n_tuples = tuples.shape[0]
    in_feats = gnn_h.shape[1]
    h_feats = w1.shape[1]
    k = tuples.shape[1] - 1  # neighbors per tuple (tuples[:, 1:])
    if k < 1:
        raise ValueError("input_tuple_length must be >= 2 (K == 0 neighbors "
                         "would make the mean undefined).")

    # Stream activations in the weight dtype when that is narrower (bf16 weights
    # => 2 B/elem over the kernel's dominant HBM stream).
    x_dtype = (w1.dtype if jnp.dtype(w1.dtype).itemsize < jnp.dtype(gnn_h.dtype).itemsize
               else gnn_h.dtype)
    x_itemsize = jnp.dtype(x_dtype).itemsize
    w_itemsize = jnp.dtype(w1.dtype).itemsize

    # --- static tile / padding selection: byte-budget tiles, bucketed N ---
    row_bytes = (k + 1) * in_feats * x_itemsize
    tile_budget = max(_LANE,
                      min(8192, _floor_pow2(max(tile_budget_bytes // max(row_bytes, 1), _LANE))))
    n_lanes = pl.cdiv(max(n_tuples, 1), _LANE) * _LANE
    if bucket:
        # Bucketed shapes: one compiled kernel serves many N values.
        if n_lanes <= 4 * tile_budget:
            padded_n = pl.next_power_of_2(n_lanes)
        else:
            step = 2 * tile_budget                      # even tile counts for large N
            padded_n = pl.cdiv(n_lanes, step) * step
    else:
        eff0 = min(tile_budget, n_lanes)
        padded_n = pl.cdiv(n_lanes, eff0) * eff0
    eff_tile = min(tile_budget, padded_n)
    if padded_n // eff_tile == 1 and padded_n >= 1024:
        # Split a single big tile so v7x's two TensorCores both get a grid step.
        eff_tile = padded_n // 2
    num_tiles = padded_n // eff_tile

    # --- JAX glue: ONE fused XLA gather, natural layout, free reshape ---
    tuples_next = tuples[:, 1:]                         # [N, K]
    tgt_idx = triplets[:, 2]                            # [N]
    pad = padded_n - n_tuples
    if pad:
        # Padded tail tuples gather gnn_h[0]; sliced off after the kernel.
        tuples_next = jnp.pad(tuples_next, ((0, pad), (0, 0)))
        tgt_idx = jnp.pad(tgt_idx, ((0, pad),))
    all_idx = jnp.concatenate([tuples_next, tgt_idx[:, None]], axis=1)   # [Np, K+1]
    rows = gnn_h[all_idx]                                                # [Np, K+1, F]
    x_nat = rows.reshape(padded_n, (k + 1) * in_feats).astype(x_dtype)   # [Np, (K+1)*F]

    # Effective first-layer weight: 1/K applied in f32 BEFORE casting to w1.dtype.
    w1f = w1.astype(jnp.float32)
    w1_eff = jnp.concatenate([w1f[:in_feats] / k] * k + [w1f[in_feats:]], axis=0)
    w1_eff = w1_eff.astype(w1.dtype)                    # [(K+1)*F, H]
    b1_2d = b1.reshape(1, h_feats)
    w2_2d = w2.reshape(h_feats, 1)
    b2_2d = b2.reshape(1, 1)

    # --- generation-aware VMEM budget ---
    try:
        vmem_cap = int(pltpu.get_tpu_info().vmem_capacity_bytes)
    except Exception:
        vmem_cap = 64 << 20                              # conservative: v7x per-TC VMEM
    tile_bytes = eff_tile * ((k + 1) * in_feats * x_itemsize + 4)
    weight_bytes = ((k + 1) * in_feats * h_feats + 2 * h_feats + 2) * w_itemsize
    need = 3 * tile_bytes + 2 * weight_bytes + (2 << 20)
    vmem_limit = int(min(max(need, 16 << 20), (3 * vmem_cap) // 4))

    # --- cost estimate for the surrounding XLA schedule ---
    flops = 2 * padded_n * ((k + 1) * in_feats * h_feats + h_feats)
    bytes_acc = padded_n * (k + 1) * in_feats * x_itemsize + weight_bytes + padded_n * 4
    cost = pl.CostEstimate(flops=int(flops), transcendentals=int(padded_n),
                           bytes_accessed=int(bytes_acc))

    out = pl.pallas_call(
        _tuple_mlp_kernel,
        out_shape=jax.ShapeDtypeStruct((padded_n, 1), jnp.float32),
        grid_spec=pltpu.PrefetchScalarGridSpec(
            num_scalar_prefetch=0,
            grid=(num_tiles,),
            in_specs=[
                pl.BlockSpec((eff_tile, (k + 1) * in_feats), lambda i: (i, 0)),
                pl.BlockSpec(((k + 1) * in_feats, h_feats), lambda i: (0, 0)),
                pl.BlockSpec((1, h_feats), lambda i: (0, 0)),
                pl.BlockSpec((h_feats, 1), lambda i: (0, 0)),
                pl.BlockSpec((1, 1), lambda i: (0, 0)),
            ],
            out_specs=pl.BlockSpec((eff_tile, 1), lambda i: (i, 0)),
        ),
        compiler_params=pltpu.CompilerParams(
            dimension_semantics=("parallel",),
            vmem_limit_bytes=vmem_limit),
        cost_estimate=cost,
    )(x_nat, w1_eff, b1_2d, w2_2d, b2_2d)

    return out[:n_tuples]                                # [N, 1]


def init_params(key, in_feats, h_feats):
    """Deterministic init mirroring nn.Linear defaults (uniform +/- 1/sqrt(fan_in))."""
    k1, k2, k3, k4 = jax.random.split(key, 4)
    bound1 = 1.0 / np.sqrt(2 * in_feats)
    bound2 = 1.0 / np.sqrt(h_feats)
    return {
        "w1": jax.random.uniform(k1, (2 * in_feats, h_feats), jnp.float32,
                                 -bound1, bound1),
        "b1": jax.random.uniform(k2, (h_feats,), jnp.float32, -bound1, bound1),
        "w2": jax.random.uniform(k3, (h_feats, 1), jnp.float32, -bound2, bound2),
        "b2": jax.random.uniform(k4, (1,), jnp.float32, -bound2, bound2),
    }


def reference_fwd(gnn_h, tuples, triplets, params):
    """Pure-JAX reference matching the PyTorch forward."""
    tuples_next = tuples[:, 1:]
    averaged_h = gnn_h[tuples_next].mean(axis=1)
    targets = gnn_h[triplets[:, 2]]
    x = jnp.concatenate([averaged_h, targets], axis=1)
    h = jnp.maximum(x @ params["w1"] + params["b1"], 0.0)
    return jax.nn.sigmoid(h @ params["w2"] + params["b2"])


if __name__ == "__main__":
    key = jax.random.PRNGKey(0)
    k_h, k_data, k_p = jax.random.split(key, 3)

    num_nodes = 32
    in_feats = 16
    h_feats = 32
    input_tuple_length = 3     # -> tuples[:, 1:] has K = 2 neighbors

    gnn_h = jax.random.normal(k_h, (num_nodes, in_feats), jnp.float32)
    params = init_params(k_p, in_feats, h_feats)

    # Cover: single small padded tile (N=16), partially padded single tile
    # (N=200), and the bucketed multi-tile path split across two grid steps
    # (N=1500 -> padded 2048, two 1024-lane tiles).
    for n_tuples in (16, 200, 1500):
        kt, ktr = jax.random.split(jax.random.fold_in(k_data, n_tuples))
        tuples = jax.random.randint(kt, (n_tuples, input_tuple_length), 0, num_nodes)
        triplets = jax.random.randint(ktr, (n_tuples, 3), 0, num_nodes)

        out = tuple_average_predictor_fwd(gnn_h, tuples, triplets, params)
        out = jax.block_until_ready(out)

        ref = reference_fwd(gnn_h, tuples, triplets, params)
        np.testing.assert_allclose(np.asarray(out), np.asarray(ref),
                                   rtol=1e-5, atol=2e-5)
        assert out.shape == (n_tuples, 1)

    print("KERNEL_OK")
</pallas_src>

<mosaic_0001>
module attributes {stable_mosaic.version = 11 : i64} {
  func.func @_tuple_mlp_kernel(%arg0: i32, %arg1: memref<128x48xf32, #tpu.memory_space<vmem>>, %arg2: memref<48x32xf32, #tpu.memory_space<vmem>>, %arg3: memref<1x32xf32, #tpu.memory_space<vmem>>, %arg4: memref<32x1xf32, #tpu.memory_space<vmem>>, %arg5: memref<1x1xf32, #tpu.memory_space<vmem>>, %arg6: memref<128x1xf32, #tpu.memory_space<vmem>>) attributes {dimension_semantics = [#tpu.dimension_semantics<parallel>], iteration_bounds = array<i64: 1>, scalar_prefetch = 0 : i64, scratch_operands = 0 : i64, tpu.core_type = #tpu.core_type<tc>, window_params = [{transform_indices = @transform_0, window_bounds = array<i64: 128, 48>}, {pipeline_mode = #tpu.pipeline_mode<synchronous>, transform_indices = @transform_1, window_bounds = array<i64: 48, 32>}, {pipeline_mode = #tpu.pipeline_mode<synchronous>, transform_indices = @transform_2, window_bounds = array<i64: 1, 32>}, {pipeline_mode = #tpu.pipeline_mode<synchronous>, transform_indices = @transform_3, window_bounds = array<i64: 32, 1>}, {pipeline_mode = #tpu.pipeline_mode<synchronous>, transform_indices = @transform_4, window_bounds = array<i64: 1, 1>}, {transform_indices = @transform_5, window_bounds = array<i64: 128, 1>}]} {
    %c0 = arith.constant 0 : index
    %c0_0 = arith.constant 0 : index
    %0 = vector.load %arg1[%c0, %c0_0] : memref<128x48xf32, #tpu.memory_space<vmem>>, vector<128x48xf32>
    %c0_1 = arith.constant 0 : index
    %c0_2 = arith.constant 0 : index
    %1 = vector.load %arg2[%c0_1, %c0_2] : memref<48x32xf32, #tpu.memory_space<vmem>>, vector<48x32xf32>
    %cst = arith.constant dense<0.000000e+00> : vector<128x32xf32>
    %2 = tpu.matmul %0, %1, %cst {dimension_numbers = #tpu.dot_dimension_numbers<[1], [0], [0], [1], [0, 0, 1, 1], [], []>} : vector<128x48xf32>, vector<48x32xf32>, vector<128x32xf32> -> vector<128x32xf32>
    %c0_3 = arith.constant 0 : index
    %c0_4 = arith.constant 0 : index
    %3 = vector.load %arg3[%c0_3, %c0_4] : memref<1x32xf32, #tpu.memory_space<vmem>>, vector<1x32xf32>
    %4 = vector.broadcast %3 : vector<1x32xf32> to vector<128x32xf32>
    %5 = arith.addf %2, %4 : vector<128x32xf32>
    %cst_5 = arith.constant 0.000000e+00 : f32
    %6 = vector.broadcast %cst_5 : f32 to vector<128x32xf32>
    %7 = arith.maximumf %5, %6 : vector<128x32xf32>
    %c0_6 = arith.constant 0 : index
    %c0_7 = arith.constant 0 : index
    %8 = vector.load %arg4[%c0_6, %c0_7] : memref<32x1xf32, #tpu.memory_space<vmem>>, vector<32x1xf32>
    %cst_8 = arith.constant dense<0.000000e+00> : vector<128x1xf32>
    %9 = tpu.matmul %7, %8, %cst_8 {dimension_numbers = #tpu.dot_dimension_numbers<[1], [0], [0], [1], [0, 0, 1, 1], [], []>} : vector<128x32xf32>, vector<32x1xf32>, vector<128x1xf32> -> vector<128x1xf32>
    %c0_9 = arith.constant 0 : index
    %c0_10 = arith.constant 0 : index
    %10 = vector.load %arg5[%c0_9, %c0_10] : memref<1x1xf32, #tpu.memory_space<vmem>>, vector<1x1xf32>
    %11 = vector.broadcast %10 : vector<1x1xf32> to vector<128x1xf32>
    %12 = arith.addf %9, %11 : vector<128x1xf32>
    %13 = arith.negf %12 : vector<128x1xf32>
    %14 = math.exp %13 : vector<128x1xf32>
    %cst_11 = arith.constant 1.000000e+00 : f32
    %15 = vector.broadcast %cst_11 : f32 to vector<128x1xf32>
    %16 = arith.addf %15, %14 : vector<128x1xf32>
    %17 = arith.divf %15, %16 : vector<128x1xf32>
    %c0_12 = arith.constant 0 : index
    %c0_13 = arith.constant 0 : index
    %18 = vector.load %arg6[%c0_12, %c0_13] : memref<128x1xf32, #tpu.memory_space<vmem>>, vector<128x1xf32>
    tpu.vector_store %arg6[%c0_12, %c0_13], %17 {strides = array<i32>} : memref<128x1xf32, #tpu.memory_space<vmem>>, vector<128x1xf32>,
    return
  }
  func.func @transform_0(%arg0: i32) -> (i32, i32) {
    %c0_i32 = arith.constant 0 : i32
    %c0_i32_0 = arith.constant 0 : i32
    return %arg0, %c0_i32 : i32, i32
  }
  func.func @transform_1(%arg0: i32) -> (i32, i32) {
    %c0_i32 = arith.constant 0 : i32
    %c0_i32_0 = arith.constant 0 : i32
    %c0_i32_1 = arith.constant 0 : i32
    return %c0_i32, %c0_i32_0 : i32, i32
  }
  func.func @transform_2(%arg0: i32) -> (i32, i32) {
    %c0_i32 = arith.constant 0 : i32
    %c0_i32_0 = arith.constant 0 : i32
    %c0_i32_1 = arith.constant 0 : i32
    return %c0_i32, %c0_i32_0 : i32, i32
  }
  func.func @transform_3(%arg0: i32) -> (i32, i32) {
    %c0_i32 = arith.constant 0 : i32
    %c0_i32_0 = arith.constant 0 : i32
    %c0_i32_1 = arith.constant 0 : i32
    return %c0_i32, %c0_i32_0 : i32, i32
  }
  func.func @transform_4(%arg0: i32) -> (i32, i32) {
    %c0_i32 = arith.constant 0 : i32
    %c0_i32_0 = arith.constant 0 : i32
    %c0_i32_1 = arith.constant 0 : i32
    return %c0_i32, %c0_i32_0 : i32, i32
  }
  func.func @transform_5(%arg0: i32) -> (i32, i32) {
    %c0_i32 = arith.constant 0 : i32
    %c0_i32_0 = arith.constant 0 : i32
    return %arg0, %c0_i32 : i32, i32
  }
}

</mosaic_0001>

<bundles_post_ra>
// kernel: tuple_average_predictor_fwd.1
= control target key start
LH: loop header
LB: loop body
LE: loop exit
PB: predicated region body
PF: predicated region fallthrough
CT: control target
= control target key end

     0   :  { %vm51_vm0 = vcmask 392192   ;;  %vm272_vm1 = vcmask 261120   ;;  %vm562_vm2 = vcmask 7168   ;;  %s1055_s1 = inlined_call_operand.vmem [shape: f32[48,32], index: 1, kind: input, shape index: {}]   ;;  %s1056_s0 = inlined_call_operand.vmem [shape: f32[128,48], index: 0, kind: input, shape index: {}]   ;;  %s1057_s3 = inlined_call_operand.vmem [shape: f32[32,1], index: 3, kind: input, shape index: {}]   ;;  %s1058_s4 = inlined_call_operand.<no memory space> [shape: f32[1,1], index: 4, kind: input, shape index: {}]   ;;  %s1059_s2 = inlined_call_operand.vmem [shape: f32[1,32], index: 2, kind: input, shape index: {}]   ;;  %s1060_s5 = inlined_call_operand.vmem [shape: f32[128,1], index: 5, kind: output, shape index: {}]  }
   0x1   :  { %v38_v0 = vld [vmem:[%s1055_s1] sm:$0xff]  ;;  %v39_v1 = vld [vmem:[%s1055_s1 + $0x8] sm:$0xff]  ;;  %v40_v2 = vld [vmem:[%s1055_s1 + $0x10] sm:$0xff]  ;;  %v10_v31 = vstv %s1058_s4 }
   0x2   :  { %v743_v3 = vpack.c.bf16 %v39_v1, %v38_v0  ;;  %v41_v4 = vld [vmem:[%s1055_s1 + $0x18] sm:$0xff]  ;;  %v42_v6 = vld [vmem:[%s1055_s1 + $0x20] sm:$0xff]  ;;  %v43_v7 = vld [vmem:[%s1055_s1 + $0x28] sm:$0xff]  ;;  %11 = vst [vmem:[#allocation2] sm:$0x1] %v10_v31 }
   0x3   :  { %v747_v5 = vpack.c.bf16 %v41_v4, %v40_v2  ;;  %v22_v8 = vld [vmem:[%s1056_s0] sm:$0xff]  ;;  %v751_v9 = vpack.c.bf16 %v43_v7, %v42_v6  ;;  %v262_v11 = vld [vmem:[%s1057_s3 + $0x8] sm:$0xff]  ;;  %v24_v14 = vld [vmem:[%s1056_s0 + $0x10] sm:$0xff] }
   0x4   :  { %744 = vmatprep.subr.bf16.mxu0 %v743_v3  ;;  %687 = vmatprep.mubr.msk.f32.mxu0 %vm51_vm0, %v22_v8  ;;  %v261_v10 = vld [vmem:[%s1057_s3] sm:$0xff]  ;;  %v23_v13 = vld [vmem:[%s1056_s0 + $0x8] sm:$0xff]  ;;  %v25_v15 = vld [vmem:[%s1056_s0 + $0x18] sm:$0xff] }
   0x5   :  { %746 = vmatpush3.bf16.msra.mxu0 %v743_v3  ;;  %v755_v12 = vpack.c.bf16 %v262_v11, %v261_v10  ;;  %v26_v16 = vld [vmem:[%s1056_s0 + $0x20] sm:$0xff]  ;;  %v27_v17 = vld [vmem:[%s1056_s0 + $0x28] sm:$0xff]  ;;  %v28_v18 = vld [vmem:[%s1056_s0 + $0x30] sm:$0xff] }
   0x6   :  { %748 = vmatprep.subr.bf16.mxu0 %v747_v5  ;;  %v29_v19 = vld [vmem:[%s1056_s0 + $0x38] sm:$0xff]  ;;  %v30_v20 = vld [vmem:[%s1056_s0 + $0x40] sm:$0xff]  ;;  %v31_v21 = vld [vmem:[%s1056_s0 + $0x48] sm:$0xff] }
   0x7   :  { %756 = vmatprep.subr.bf16.mxu1 %v755_v12  ;;  %v32_v22 = vld [vmem:[%s1056_s0 + $0x50] sm:$0xff]  ;;  %v33_v23 = vld [vmem:[%s1056_s0 + $0x58] sm:$0xff]  ;;  %v34_v24 = vld [vmem:[%s1056_s0 + $0x60] sm:$0xff] }
   0x8   :  { %758 = vmatpush3.bf16.msra.mxu1 %v755_v12  ;;  %v35_v25 = vld [vmem:[%s1056_s0 + $0x68] sm:$0xff]  ;;  %v36_v26 = vld [vmem:[%s1056_s0 + $0x70] sm:$0xff]  ;;  %v37_v27 = vld [vmem:[%s1056_s0 + $0x78] sm:$0xff] }
   0x9   :  { %750 = vmatpush3.bf16.msra.mxu0 %v747_v5  ;;  %v263_v28 = vld [vmem:[%s1057_s3 + $0x10] sm:$0xff]  ;;  %v264_v29 = vld [vmem:[%s1057_s3 + $0x18] sm:$0xff]  ;;  %v583_v32 = vld [vmem:[%s1059_s2] ss:$0 sm:$0xff] }
   0xa   :  { %752 = vmatprep.subr.bf16.mxu0 %v751_v9  ;;  %v759_v30 = vpack.c.bf16 %v264_v29, %v263_v28 }
   0xc   :  { %760 = vmatprep.subr.bf16.mxu1 %v759_v30 }
   0xd   :  { %754 = vmatpush3.bf16.msra.mxu0 %v751_v9  ;;  %762 = vmatpush3.bf16.msra.mxu1 %v759_v30 }
  0x10   :  { %688 = vmatmul.mubr.msk.f32.vlgmr.msra.gmra.mrb[0].mxu0 %vm51_vm0, %v23_v13 }
  0x11   :  { %690 = vmatprep.mubr.msk.f32.mxu0 %vm51_vm0, %v24_v14 }
  0x14   :  { %691 = vmatmul.mubr.msk.f32.gmra.mrb[2].mxu0 %vm51_vm0, %v25_v15 }
  0x15   :  { %693 = vmatprep.mubr.msk.f32.mxu0 %vm51_vm0, %v26_v16 }
  0x18   :  { %694 = vmatmul.mubr.msk.f32.gmra.mrb[4].mxu0 %vm51_vm0, %v27_v17  ;;  %v973_v17 = vld [vmem:[#allocation2] ss:$0 sm:$0xff] }
  0x19   :  { %696 = vmatprep.mubr.msk.f32.mxu0 %vm51_vm0, %v28_v18 }
  0x1c   :  { %697 = vmatmul.mubr.msk.f32.gmra.mrb[6].mxu0 %vm51_vm0, %v29_v19 }
  0x1d   :  { %699 = vmatprep.mubr.msk.f32.mxu0 %vm51_vm0, %v30_v20 }
  0x20   :  { %700 = vmatmul.mubr.msk.f32.gmra.mrb[8].mxu0 %vm51_vm0, %v31_v21 }
  0x21   :  { %702 = vmatprep.mubr.msk.f32.mxu0 %vm51_vm0, %v32_v22 }
  0x24   :  { %703 = vmatmul.mubr.msk.f32.gmra.mrb[10].mxu0 %vm51_vm0, %v33_v23 }
  0x25   :  { %705 = vmatprep.mubr.msk.f32.mxu0 %vm51_vm0, %v34_v24 }
  0x28   :  { %706 = vmatmul.mubr.msk.f32.gmra.mrb[12].mxu0 %vm51_vm0, %v35_v25 }
  0x29   :  { %708 = vmatprep.mubr.msk.f32.mxu0 %vm51_vm0, %v36_v26 }
  0x2c   :  { %709 = vmatmul.mubr.msk.f32.gmra.mrb[14].mxu0 %vm51_vm0, %v37_v27 }
  0xe3   :  { %v689_v33 = vpop.f32.mrb[0].mxu0 }
  0xe4   :  { %v172_v34 = vadd.f32 %v689_v33, %v583_v32  ;;  %v166_v35 = vpop.f32.mrb[1].mxu0 }
  0xe5   :  { %v167_v36 = vadd.f32 %v583_v32, %v166_v35 }
  0xe6   :  { %v246_v39 = vmax.f32 %v172_v34, 0.0 }
  0xe7   :  { %v245_v37 = vmax.f32 %v167_v36, 0.0  ;;  %v692_v38 = vpop.f32.mrb[2].mxu0 }
  0xe8   :  { %v182_v40 = vadd.f32 %v692_v38, %v583_v32  ;;  %v176_v41 = vpop.f32.mrb[3].mxu0 }
  0xe9   :  { %v177_v42 = vadd.f32 %v583_v32, %v176_v41  ;;  %719 = vmatprep.mubr.msk.f32.mxu1 %vm272_vm1, %v245_v37 }
  0xea   :  { %720 = vmatmul.mubr.msk.f32.vlgmr.msra.gmra.mrb[0].mxu1 %vm272_vm1, %v246_v39  ;;  %v248_v45 = vmax.f32 %v182_v40, 0.0 }
  0xeb   :  { %v247_v43 = vmax.f32 %v177_v42, 0.0  ;;  %v695_v44 = vpop.f32.mrb[4].mxu0 }
  0xec   :  { %v192_v46 = vadd.f32 %v695_v44, %v583_v32  ;;  %v186_v47 = vpop.f32.mrb[5].mxu0 }
  0xed   :  { %v187_v48 = vadd.f32 %v583_v32, %v186_v47  ;;  %722 = vmatprep.mubr.msk.f32.mxu1 %vm272_vm1, %v247_v43 }
  0xee   :  { %723 = vmatmul.mubr.msk.f32.gmra.mrb[2].mxu1 %vm272_vm1, %v248_v45  ;;  %v250_v51 = vmax.f32 %v192_v46, 0.0 }
  0xef   :  { %v249_v49 = vmax.f32 %v187_v48, 0.0  ;;  %v698_v50 = vpop.f32.mrb[6].mxu0 }
  0xf0   :  { %v202_v52 = vadd.f32 %v698_v50, %v583_v32  ;;  %v196_v53 = vpop.f32.mrb[7].mxu0 }
  0xf1   :  { %v197_v54 = vadd.f32 %v583_v32, %v196_v53  ;;  %725 = vmatprep.mubr.msk.f32.mxu1 %vm272_vm1, %v249_v49 }
  0xf2   :  { %726 = vmatmul.mubr.msk.f32.gmra.mrb[4].mxu1 %vm272_vm1, %v250_v51  ;;  %v252_v57 = vmax.f32 %v202_v52, 0.0 }
  0xf3   :  { %v251_v55 = vmax.f32 %v197_v54, 0.0  ;;  %v701_v56 = vpop.f32.mrb[8].mxu0 }
  0xf4   :  { %v212_v58 = vadd.f32 %v701_v56, %v583_v32  ;;  %v206_v59 = vpop.f32.mrb[9].mxu0 }
  0xf5   :  { %v207_v60 = vadd.f32 %v583_v32, %v206_v59  ;;  %728 = vmatprep.mubr.msk.f32.mxu1 %vm272_vm1, %v251_v55 }
  0xf6   :  { %729 = vmatmul.mubr.msk.f32.gmra.mrb[6].mxu1 %vm272_vm1, %v252_v57  ;;  %v254_v63 = vmax.f32 %v212_v58, 0.0 }
  0xf7   :  { %v253_v61 = vmax.f32 %v207_v60, 0.0  ;;  %v704_v62 = vpop.f32.mrb[10].mxu0 }
  0xf8   :  { %v222_v0 = vadd.f32 %v704_v62, %v583_v32  ;;  %v216_v1 = vpop.f32.mrb[11].mxu0 }
  0xf9   :  { %v217_v2 = vadd.f32 %v583_v32, %v216_v1  ;;  %731 = vmatprep.mubr.msk.f32.mxu1 %vm272_vm1, %v253_v61 }
  0xfa   :  { %732 = vmatmul.mubr.msk.f32.gmra.mrb[8].mxu1 %vm272_vm1, %v254_v63  ;;  %v256_v5 = vmax.f32 %v222_v0, 0.0 }
  0xfb   :  { %v255_v3 = vmax.f32 %v217_v2, 0.0  ;;  %v707_v4 = vpop.f32.mrb[12].mxu0 }
  0xfc   :  { %v232_v6 = vadd.f32 %v707_v4, %v583_v32  ;;  %v226_v7 = vpop.f32.mrb[13].mxu0 }
  0xfd   :  { %v227_v8 = vadd.f32 %v583_v32, %v226_v7  ;;  %734 = vmatprep.mubr.msk.f32.mxu1 %vm272_vm1, %v255_v3 }
  0xfe   :  { %735 = vmatmul.mubr.msk.f32.gmra.mrb[10].mxu1 %vm272_vm1, %v256_v5  ;;  %v258_v11 = vmax.f32 %v232_v6, 0.0 }
  0xff   :  { %v257_v9 = vmax.f32 %v227_v8, 0.0  ;;  %v710_v10 = vpop.f32.mrb[14].mxu0 }
 0x100   :  { %v242_v12 = vadd.f32 %v710_v10, %v583_v32  ;;  %v236_v13 = vpop.f32.mrb[15].mxu0 }
 0x101   :  { %v237_v14 = vadd.f32 %v583_v32, %v236_v13  ;;  %737 = vmatprep.mubr.msk.f32.mxu1 %vm272_vm1, %v257_v9 }
 0x102   :  { %738 = vmatmul.mubr.msk.f32.gmra.mrb[12].mxu1 %vm272_vm1, %v258_v11  ;;  %v260_v16 = vmax.f32 %v242_v12, 0.0 }
 0x103   :  { %v259_v15 = vmax.f32 %v237_v14, 0.0 }
 0x105   :  { %740 = vmatprep.mubr.msk.f32.mxu1 %vm272_vm1, %v259_v15 }
 0x106   :  { %741 = vmatmul.mubr.msk.f32.gmra.mrb[14].mxu1 %vm272_vm1, %v260_v16 }
 0x1bd   :  { %v721_v18 = vpop.f32.mrb[0].mxu1 }
 0x1be   :  { %v393_v19 = vadd.f32 %v721_v18, %v973_v17  ;;  %v387_v20 = vpop.f32.mrb[1].mxu1 }
 0x1bf   :  { %v388_v21 = vadd.f32 %v973_v17, %v387_v20 }
 0x1c0   :  { %v618_v22 = vmul.f32 -1.442695, %v393_v19 }
 0x1c1   :  { %v617_v23 = vmul.f32 -1.442695, %v388_v21  ;;  %v724_v24 = vpop.f32.mrb[2].mxu1 }
 0x1c2   :  { %763 = vpow2.f32 %v618_v22  ;;  %v403_v25 = vadd.f32 %v724_v24, %v973_v17  ;;  %v397_v26 = vpop.f32.mrb[3].mxu1 }
 0x1c3   :  { %765 = vpow2.f32 %v617_v23  ;;  %v398_v27 = vadd.f32 %v973_v17, %v397_v26 }
 0x1c4   :  { %v620_v28 = vmul.f32 -1.442695, %v403_v25 }
 0x1c5   :  { %v619_v29 = vmul.f32 -1.442695, %v398_v27  ;;  %v727_v30 = vpop.f32.mrb[4].mxu1 }
 0x1c6   :  { %767 = vpow2.f32 %v620_v28  ;;  %v413_v31 = vadd.f32 %v727_v30, %v973_v17  ;;  %v407_v32 = vpop.f32.mrb[5].mxu1 }
 0x1c7   :  { %769 = vpow2.f32 %v619_v29  ;;  %v408_v33 = vadd.f32 %v973_v17, %v407_v32 }
 0x1c8   :  { %v622_v34 = vmul.f32 -1.442695, %v413_v31 }
 0x1c9   :  { %v621_v35 = vmul.f32 -1.442695, %v408_v33  ;;  %v730_v36 = vpop.f32.mrb[6].mxu1 }
 0x1ca   :  { %771 = vpow2.f32 %v622_v34  ;;  %v423_v37 = vadd.f32 %v730_v36, %v973_v17  ;;  %v417_v38 = vpop.f32.mrb[7].mxu1 }
 0x1cb   :  { %773 = vpow2.f32 %v621_v35  ;;  %v418_v39 = vadd.f32 %v973_v17, %v417_v38 }
 0x1cc   :  { %v764_v40 = vpop.eup %763  ;;  %v624_v41 = vmul.f32 -1.442695, %v423_v37 }
 0x1cd   :  { %v766_v42 = vpop.eup %765  ;;  %v515_v43 = vadd.f32 1.0, %v764_v40  ;;  %v623_v44 = vmul.f32 -1.442695, %v418_v39  ;;  %v733_v45 = vpop.f32.mrb[8].mxu1 }
 0x1ce   :  { %v514_v46 = vadd.f32 1.0, %v766_v42  ;;  %775 = vpow2.f32 %v624_v41  ;;  %v433_v47 = vadd.f32 %v733_v45, %v973_v17  ;;  %v427_v48 = vpop.f32.mrb[9].mxu1 }
 0x1cf   :  { %777 = vrcp.f32 %v515_v43  ;;  %v428_v49 = vadd.f32 %v973_v17, %v427_v48 }
 0x1d0   :  { %v768_v50 = vpop.eup %767  ;;  %779 = vrcp.f32 %v514_v46  ;;  %v626_v51 = vmul.f32 -1.442695, %v433_v47 }
 0x1d1   :  { %v770_v52 = vpop.eup %769  ;;  %v517_v53 = vadd.f32 1.0, %v768_v50  ;;  %781 = vpow2.f32 %v623_v44  ;;  %v625_v54 = vmul.f32 -1.442695, %v428_v49  ;;  %v736_v55 = vpop.f32.mrb[10].mxu1 }
 0x1d2   :  { %v516_v56 = vadd.f32 1.0, %v770_v52  ;;  %783 = vpow2.f32 %v626_v51  ;;  %v443_v57 = vadd.f32 %v736_v55, %v973_v17  ;;  %v437_v58 = vpop.f32.mrb[11].mxu1 }
 0x1d3   :  { %785 = vrcp.f32 %v517_v53  ;;  %v438_v59 = vadd.f32 %v973_v17, %v437_v58 }
 0x1d4   :  { %v772_v60 = vpop.eup %771  ;;  %787 = vrcp.f32 %v516_v56  ;;  %v628_v61 = vmul.f32 -1.442695, %v443_v57 }
 0x1d5   :  { %v774_v62 = vpop.eup %773  ;;  %v519_v63 = vadd.f32 1.0, %v772_v60  ;;  %789 = vpow2.f32 %v625_v54  ;;  %v627_v0 = vmul.f32 -1.442695, %v438_v59  ;;  %v739_v1 = vpop.f32.mrb[12].mxu1 }
 0x1d6   :  { %v518_v2 = vadd.f32 1.0, %v774_v62  ;;  %791 = vpow2.f32 %v628_v61  ;;  %v453_v3 = vadd.f32 %v739_v1, %v973_v17  ;;  %v447_v4 = vpop.f32.mrb[13].mxu1 }
 0x1d7   :  { %793 = vrcp.f32 %v519_v63  ;;  %v448_v5 = vadd.f32 %v973_v17, %v447_v4 }
 0x1d8   :  { %v776_v6 = vpop.eup %775  ;;  %795 = vrcp.f32 %v518_v2  ;;  %v630_v7 = vmul.f32 -1.442695, %v453_v3 }
 0x1d9   :  { %v778_v8 = vpop.eup %777  ;;  %v521_v9 = vadd.f32 1.0, %v776_v6  ;;  %797 = vpow2.f32 %v627_v0  ;;  %v629_v10 = vmul.f32 -1.442695, %v448_v5  ;;  %v742_v11 = vpop.f32.mrb[14].mxu1 }
 0x1da   :  { %v780_v12 = vpop.eup %779  ;;  %564 = vst.msk [vmem:[%s1060_s5 + $0x8] sm:$0xff] %vm562_vm2, %v778_v8  ;;  %799 = vpow2.f32 %v630_v7  ;;  %v463_v13 = vadd.f32 %v742_v11, %v973_v17  ;;  %v457_v14 = vpop.f32.mrb[15].mxu1 }
 0x1db   :  { %v782_v15 = vpop.eup %781  ;;  %563 = vst.msk [vmem:[%s1060_s5] sm:$0xff] %vm562_vm2, %v780_v12  ;;  %801 = vrcp.f32 %v521_v9  ;;  %v458_v16 = vadd.f32 %v973_v17, %v457_v14 }
 0x1dc   :  { %v784_v18 = vpop.eup %783  ;;  %v520_v19 = vadd.f32 1.0, %v782_v15  ;;  %803 = vpow2.f32 %v629_v10  ;;  %v632_v20 = vmul.f32 -1.442695, %v463_v13 }
 0x1dd   :  { %v786_v21 = vpop.eup %785  ;;  %v523_v22 = vadd.f32 1.0, %v784_v18  ;;  %v631_v23 = vmul.f32 -1.442695, %v458_v16 }
 0x1de   :  { %v788_v24 = vpop.eup %787  ;;  %566 = vst.msk [vmem:[%s1060_s5 + $0x18] sm:$0xff] %vm562_vm2, %v786_v21  ;;  %805 = vrcp.f32 %v520_v19 }
 0x1df   :  { %v790_v25 = vpop.eup %789  ;;  %565 = vst.msk [vmem:[%s1060_s5 + $0x10] sm:$0xff] %vm562_vm2, %v788_v24  ;;  %807 = vrcp.f32 %v523_v22 }
 0x1e0   :  { %v792_v17 = vpop.eup %791  ;;  %v522_v26 = vadd.f32 1.0, %v790_v25  ;;  %809 = vpow2.f32 %v632_v20 }
 0x1e1   :  { %v794_v27 = vpop.eup %793  ;;  %v525_v28 = vadd.f32 1.0, %v792_v17  ;;  %811 = vpow2.f32 %v631_v23 }
 0x1e2   :  { %v796_v29 = vpop.eup %795  ;;  %568 = vst.msk [vmem:[%s1060_s5 + $0x28] sm:$0xff] %vm562_vm2, %v794_v27  ;;  %813 = vrcp.f32 %v522_v26 }
 0x1e3   :  { %v798_v30 = vpop.eup %797  ;;  %567 = vst.msk [vmem:[%s1060_s5 + $0x20] sm:$0xff] %vm562_vm2, %v796_v29  ;;  %815 = vrcp.f32 %v525_v28 }
 0x1e4   :  { %v800_v31 = vpop.eup %799  ;;  %v524_v32 = vadd.f32 1.0, %v798_v30 }
 0x1e5   :  { %v802_v33 = vpop.eup %801  ;;  %v527_v34 = vadd.f32 1.0, %v800_v31 }
 0x1e6   :  { %v804_v35 = vpop.eup %803  ;;  %570 = vst.msk [vmem:[%s1060_s5 + $0x38] sm:$0xff] %vm562_vm2, %v802_v33  ;;  %817 = vrcp.f32 %v524_v32 }
 0x1e7   :  { %819 = vrcp.f32 %v527_v34  ;;  %v526_v36 = vadd.f32 1.0, %v804_v35 }
 0x1e8   :  { %v806_v37 = vpop.eup %805 }
 0x1e9   :  { %v808_v38 = vpop.eup %807  ;;  %569 = vst.msk [vmem:[%s1060_s5 + $0x30] sm:$0xff] %vm562_vm2, %v806_v37  ;;  %821 = vrcp.f32 %v526_v36 }
 0x1ea   :  { %v810_v39 = vpop.eup %809  ;;  %572 = vst.msk [vmem:[%s1060_s5 + $0x48] sm:$0xff] %vm562_vm2, %v808_v38 }
 0x1eb   :  { %v812_v40 = vpop.eup %811  ;;  %v529_v41 = vadd.f32 1.0, %v810_v39 }
 0x1ec   :  { %v814_v42 = vpop.eup %813  ;;  %v528_v43 = vadd.f32 1.0, %v812_v40 }
 0x1ed   :  { %v816_v44 = vpop.eup %815  ;;  %571 = vst.msk [vmem:[%s1060_s5 + $0x40] sm:$0xff] %vm562_vm2, %v814_v42  ;;  %823 = vrcp.f32 %v529_v41 }
 0x1ee   :  { %574 = vst.msk [vmem:[%s1060_s5 + $0x58] sm:$0xff] %vm562_vm2, %v816_v44  ;;  %825 = vrcp.f32 %v528_v43 }
 0x1f0   :  { %v818_v45 = vpop.eup %817 }
 0x1f1   :  { %v820_v46 = vpop.eup %819  ;;  %573 = vst.msk [vmem:[%s1060_s5 + $0x50] sm:$0xff] %vm562_vm2, %v818_v45 }
 0x1f2   :  { %576 = vst.msk [vmem:[%s1060_s5 + $0x68] sm:$0xff] %vm562_vm2, %v820_v46 }
 0x1f3   :  { %v822_v47 = vpop.eup %821 }
 0x1f4   :  { %575 = vst.msk [vmem:[%s1060_s5 + $0x60] sm:$0xff] %vm562_vm2, %v822_v47 }
 0x1f7   :  { %v824_v48 = vpop.eup %823 }
 0x1f8   :  { %v826_v49 = vpop.eup %825  ;;  %578 = vst.msk [vmem:[%s1060_s5 + $0x78] sm:$0xff] %vm562_vm2, %v824_v48 }
 0x1f9   :  { %577 = vst.msk [vmem:[%s1060_s5 + $0x70] sm:$0xff] %vm562_vm2, %v826_v49 }

</bundles_post_ra>
